<compile_context>
chip_gen: v7x
topology: tpu7x:2x2x1
jax: 0.10.0
libtpu: 0.0.40
codegen_flags: <defaults>
</compile_context>

<pallas_src>
import functools

import jax
import jax.numpy as jnp
from jax import lax
from jax.experimental import pallas as pl
from jax.experimental.pallas import tpu as pltpu


def _self_attention_kernel(x_ref, w_ref, b_ref, o_ref, *,
                           batch_size, context_size, n_features):
    # x_ref: (B*S, F)  -- batches stacked along sublanes
    # w_ref: (F, 3F)   -- fused [Wq^T | Wk^T | Wv^T]
    # b_ref: (1, 3F)   -- fused [bq | bk | bv]
    # o_ref: (B*S, F)
    B, S, F = batch_size, context_size, n_features
    scale = 1.0 / (float(F) ** 0.5)

    # One fused QKV projection for ALL batches (single MXU matmul); bias added once.
    qkv = jnp.dot(x_ref[...], w_ref[...],
                  preferred_element_type=jnp.float32) + b_ref[...]        # (B*S, 3F)

    # Split q/k/v once (3 lane slices total, not per batch).
    q_all = qkv[:, 0 * F:1 * F]
    k_all = qkv[:, 1 * F:2 * F]
    v_all = qkv[:, 2 * F:3 * F]

    for i in range(B):                          # static unroll; B is tiny
        rows = slice(i * S, (i + 1) * S)        # static sublane row slice
        q = q_all[rows, :]                      # (S, F)
        k = k_all[rows, :]
        v = v_all[rows, :]

        # scores = q @ k^T / sqrt(F), contracting last dims (no materialized k.T)
        s = lax.dot_general(q, k, (((1,), (1,)), ((), ())),
                            preferred_element_type=jnp.float32) * scale   # (S, S)

        # numerically-stable, EXACT softmax over the last axis
        m = jnp.max(s, axis=-1, keepdims=True)
        e = jnp.exp(s - m)
        p = e / jnp.sum(e, axis=-1, keepdims=True)

        # Direct sublane-slice store; no concat, no temporary output slab.
        o_ref[rows, :] = jnp.dot(p, v,
                                 preferred_element_type=jnp.float32).astype(o_ref.dtype)


def fuse_qkv_params(wq, wk, wv, bq, bk, bv):
    """Fuse nn.Linear params into one (F,3F) weight + (1,3F) bias.

    Call ONCE at parameter-setup time, not per forward call, so the transposes
    and concats are not re-executed on every invocation.
    """
    F = wq.shape[0]
    # nn.Linear computes x @ W^T + b -> pre-transpose and concatenate.
    w_qkv = jnp.concatenate([wq.T, wk.T, wv.T], axis=1)         # (F, 3F)
    b_qkv = jnp.concatenate([bq, bk, bv]).reshape(1, 3 * F)     # (1, 3F)
    return w_qkv, b_qkv


@jax.jit
def self_attention(x, w_qkv, b_qkv):
    """x: (S, B, F) float32. w_qkv: (F, 3F); b_qkv: (1, 3F). Returns (S, B, F)."""
    S, B, F = x.shape

    # Stack batches along sublanes: (S, B, F) -> (B, S, F) -> (B*S, F).
    x2 = jnp.transpose(x, (1, 0, 2)).reshape(B * S, F)

    vmem = pl.BlockSpec(memory_space=pltpu.MemorySpace.VMEM)
    out2 = pl.pallas_call(
        functools.partial(_self_attention_kernel,
                          batch_size=B, context_size=S, n_features=F),
        out_shape=jax.ShapeDtypeStruct((B * S, F), jnp.float32),
        in_specs=[vmem, vmem, vmem],
        out_specs=vmem,
    )(x2, w_qkv, b_qkv)

    return jnp.transpose(out2.reshape(B, S, F), (1, 0, 2))


def _reference(x, wq, wk, wv, bq, bk, bv):
    S, B, F = x.shape
    q = jnp.einsum("sbf,of->sbo", x, wq) + bq
    k = jnp.einsum("sbf,of->sbo", x, wk) + bk
    v = jnp.einsum("sbf,of->sbo", x, wv) + bv
    scale = 1.0 / (float(F) ** 0.5)
    outs = []
    for i in range(B):
        s = (q[:, i, :] @ k[:, i, :].T) * scale
        p = jax.nn.softmax(s, axis=-1)
        outs.append(p @ v[:, i, :])
    return jnp.stack(outs, axis=1)


if __name__ == "__main__":
    # Small shapes implied by forward: context_size=8, batch_size=2, n_features=32
    S, B, F = 8, 2, 32
    key = jax.random.PRNGKey(0)
    kx, kq, kk, kv, kbq, kbk, kbv = jax.random.split(key, 7)

    x = jax.random.normal(kx, (S, B, F), dtype=jnp.float32)
    # torch nn.Linear shapes: weight (F, F), bias (F,)
    wq = jax.random.normal(kq, (F, F), dtype=jnp.float32) * 0.1
    wk = jax.random.normal(kk, (F, F), dtype=jnp.float32) * 0.1
    wv = jax.random.normal(kv, (F, F), dtype=jnp.float32) * 0.1
    bq = jax.random.normal(kbq, (F,), dtype=jnp.float32) * 0.1
    bk = jax.random.normal(kbk, (F,), dtype=jnp.float32) * 0.1
    bv = jax.random.normal(kbv, (F,), dtype=jnp.float32) * 0.1

    # Parameter-setup time: fuse once, reuse across calls.
    w_qkv, b_qkv = fuse_qkv_params(wq, wk, wv, bq, bk, bv)

    out = self_attention(x, w_qkv, b_qkv)
    jax.block_until_ready(out)

    ref = _reference(x, wq, wk, wv, bq, bk, bv)
    assert out.shape == (S, B, F)
    assert jnp.allclose(out, ref, atol=1e-5, rtol=1e-5), "mismatch vs reference"

    print("KERNEL_OK")
</pallas_src>

<mosaic_0001>
module attributes {stable_mosaic.version = 11 : i64} {
  func.func @_self_attention_kernel(%arg0: memref<16x32xf32, #tpu.memory_space<vmem>>, %arg1: memref<32x96xf32, #tpu.memory_space<vmem>>, %arg2: memref<1x96xf32, #tpu.memory_space<vmem>>, %arg3: memref<16x32xf32, #tpu.memory_space<vmem>>) attributes {dimension_semantics = [], scalar_prefetch = 0 : i64, scratch_operands = 0 : i64, tpu.core_type = #tpu.core_type<tc>} {
    %c0 = arith.constant 0 : index
    %c0_0 = arith.constant 0 : index
    %0 = vector.load %arg0[%c0, %c0_0] : memref<16x32xf32, #tpu.memory_space<vmem>>, vector<16x32xf32>
    %c0_1 = arith.constant 0 : index
    %c0_2 = arith.constant 0 : index
    %1 = vector.load %arg1[%c0_1, %c0_2] : memref<32x96xf32, #tpu.memory_space<vmem>>, vector<32x96xf32>
    %cst = arith.constant dense<0.000000e+00> : vector<16x96xf32>
    %2 = tpu.matmul %0, %1, %cst {dimension_numbers = #tpu.dot_dimension_numbers<[1], [0], [0], [1], [0, 0, 1, 1], [], []>} : vector<16x32xf32>, vector<32x96xf32>, vector<16x96xf32> -> vector<16x96xf32>
    %c0_3 = arith.constant 0 : index
    %c0_4 = arith.constant 0 : index
    %3 = vector.load %arg2[%c0_3, %c0_4] : memref<1x96xf32, #tpu.memory_space<vmem>>, vector<1x96xf32>
    %4 = vector.broadcast %3 : vector<1x96xf32> to vector<16x96xf32>
    %5 = arith.addf %2, %4 : vector<16x96xf32>
    %6 = vector.extract_strided_slice %5 {offsets = [0, 0], sizes = [16, 32], strides = [1, 1]} : vector<16x96xf32> to vector<16x32xf32>
    %7 = vector.extract_strided_slice %5 {offsets = [0, 32], sizes = [16, 32], strides = [1, 1]} : vector<16x96xf32> to vector<16x32xf32>
    %8 = vector.extract_strided_slice %5 {offsets = [0, 64], sizes = [16, 32], strides = [1, 1]} : vector<16x96xf32> to vector<16x32xf32>
    %9 = vector.extract_strided_slice %6 {offsets = [0, 0], sizes = [8, 32], strides = [1, 1]} : vector<16x32xf32> to vector<8x32xf32>
    %10 = vector.extract_strided_slice %7 {offsets = [0, 0], sizes = [8, 32], strides = [1, 1]} : vector<16x32xf32> to vector<8x32xf32>
    %11 = vector.extract_strided_slice %8 {offsets = [0, 0], sizes = [8, 32], strides = [1, 1]} : vector<16x32xf32> to vector<8x32xf32>
    %cst_5 = arith.constant dense<0.000000e+00> : vector<8x8xf32>
    %12 = tpu.matmul %9, %10, %cst_5 {dimension_numbers = #tpu.dot_dimension_numbers<[1], [1], [0], [0], [0, 0, 1, 0], [], []>} : vector<8x32xf32>, vector<8x32xf32>, vector<8x8xf32> -> vector<8x8xf32>
    %cst_6 = arith.constant 0.176776692 : f32
    %13 = vector.broadcast %cst_6 : f32 to vector<8x8xf32>
    %14 = arith.mulf %12, %13 : vector<8x8xf32>
    %cst_7 = arith.constant dense<0xFF800000> : vector<8xf32>
    %15 = vector.multi_reduction <maximumf>, %14, %cst_7 [1] : vector<8x8xf32> to vector<8xf32>
    %16 = vector.shape_cast %15 : vector<8xf32> to vector<8x1xf32>
    %17 = vector.broadcast %16 : vector<8x1xf32> to vector<8x8xf32>
    %18 = arith.subf %14, %17 : vector<8x8xf32>
    %19 = math.exp %18 : vector<8x8xf32>
    %cst_8 = arith.constant dense<0.000000e+00> : vector<8xf32>
    %20 = vector.multi_reduction <add>, %19, %cst_8 [1] : vector<8x8xf32> to vector<8xf32>
    %21 = vector.shape_cast %20 : vector<8xf32> to vector<8x1xf32>
    %22 = vector.broadcast %21 : vector<8x1xf32> to vector<8x8xf32>
    %23 = arith.divf %19, %22 : vector<8x8xf32>
    %cst_9 = arith.constant dense<0.000000e+00> : vector<8x32xf32>
    %24 = tpu.matmul %23, %11, %cst_9 {dimension_numbers = #tpu.dot_dimension_numbers<[1], [0], [0], [1], [0, 0, 1, 1], [], []>} : vector<8x8xf32>, vector<8x32xf32>, vector<8x32xf32> -> vector<8x32xf32>
    %c0_10 = arith.constant 0 : index
    %c0_11 = arith.constant 0 : index
    %25 = vector.load %arg3[%c0_10, %c0_11] : memref<16x32xf32, #tpu.memory_space<vmem>>, vector<8x32xf32>
    tpu.vector_store %arg3[%c0_10, %c0_11], %24 {strides = array<i32>} : memref<16x32xf32, #tpu.memory_space<vmem>>, vector<8x32xf32>,
    %26 = vector.extract_strided_slice %6 {offsets = [8, 0], sizes = [8, 32], strides = [1, 1]} : vector<16x32xf32> to vector<8x32xf32>
    %27 = vector.extract_strided_slice %7 {offsets = [8, 0], sizes = [8, 32], strides = [1, 1]} : vector<16x32xf32> to vector<8x32xf32>
    %28 = vector.extract_strided_slice %8 {offsets = [8, 0], sizes = [8, 32], strides = [1, 1]} : vector<16x32xf32> to vector<8x32xf32>
    %cst_12 = arith.constant dense<0.000000e+00> : vector<8x8xf32>
    %29 = tpu.matmul %26, %27, %cst_12 {dimension_numbers = #tpu.dot_dimension_numbers<[1], [1], [0], [0], [0, 0, 1, 0], [], []>} : vector<8x32xf32>, vector<8x32xf32>, vector<8x8xf32> -> vector<8x8xf32>
    %cst_13 = arith.constant 0.176776692 : f32
    %30 = vector.broadcast %cst_13 : f32 to vector<8x8xf32>
    %31 = arith.mulf %29, %30 : vector<8x8xf32>
    %cst_14 = arith.constant dense<0xFF800000> : vector<8xf32>
    %32 = vector.multi_reduction <maximumf>, %31, %cst_14 [1] : vector<8x8xf32> to vector<8xf32>
    %33 = vector.shape_cast %32 : vector<8xf32> to vector<8x1xf32>
    %34 = vector.broadcast %33 : vector<8x1xf32> to vector<8x8xf32>
    %35 = arith.subf %31, %34 : vector<8x8xf32>
    %36 = math.exp %35 : vector<8x8xf32>
    %cst_15 = arith.constant dense<0.000000e+00> : vector<8xf32>
    %37 = vector.multi_reduction <add>, %36, %cst_15 [1] : vector<8x8xf32> to vector<8xf32>
    %38 = vector.shape_cast %37 : vector<8xf32> to vector<8x1xf32>
    %39 = vector.broadcast %38 : vector<8x1xf32> to vector<8x8xf32>
    %40 = arith.divf %36, %39 : vector<8x8xf32>
    %cst_16 = arith.constant dense<0.000000e+00> : vector<8x32xf32>
    %41 = tpu.matmul %40, %28, %cst_16 {dimension_numbers = #tpu.dot_dimension_numbers<[1], [0], [0], [1], [0, 0, 1, 1], [], []>} : vector<8x8xf32>, vector<8x32xf32>, vector<8x32xf32> -> vector<8x32xf32>
    %c8 = arith.constant 8 : index
    %c0_17 = arith.constant 0 : index
    %42 = vector.load %arg3[%c8, %c0_17] : memref<16x32xf32, #tpu.memory_space<vmem>>, vector<8x32xf32>
    tpu.vector_store %arg3[%c8, %c0_17], %41 {strides = array<i32>} : memref<16x32xf32, #tpu.memory_space<vmem>>, vector<8x32xf32>,
    return
  }
}

</mosaic_0001>

<bundles_post_ra>
// kernel: self_attention.1
= control target key start
LH: loop header
LB: loop body
LE: loop exit
PB: predicated region body
PF: predicated region fallthrough
CT: control target
= control target key end

     0   :  { %vm27_vm0 = vcmask 261120   ;;  %v520_v8 = vmov 0.0   ;;  %vm521_vm1 = vmmov 0   ;;  %vm187_vm2 = vcmask 64512   ;;  %s597_s1 = inlined_call_operand.vmem [shape: f32[32,96], index: 1, kind: input, shape index: {}]   ;;  %s598_s0 = inlined_call_operand.vmem [shape: f32[16,32], index: 0, kind: input, shape index: {}]   ;;  %s599_s2 = inlined_call_operand.vmem [shape: f32[1,96], index: 2, kind: input, shape index: {}]   ;;  %s600_s3 = inlined_call_operand.vmem [shape: f32[16,32], index: 3, kind: output, shape index: {}]  }
   0x1   :  { %v16_v0 = vld [vmem:[%s597_s1] sm:$0xff]  ;;  %v17_v1 = vld [vmem:[%s597_s1 + $0x8] sm:$0xff]  ;;  %v18_v2 = vld [vmem:[%s597_s1 + $0x10] sm:$0xff]  ;;  %480 = vmatprep.subr.mxu1 %v520_v8  ;;  %482 = vmatprep.mubr.msk.f32.mxu1 %vm521_vm1, %v520_v8 }
   0x2   :  { %v500_v3 = vpack.c.bf16 %v17_v1, %v16_v0  ;;  %v19_v4 = vld [vmem:[%s597_s1 + $0x18] sm:$0xff]  ;;  %v14_v5 = vld [vmem:[%s598_s0] sm:$0xff]  ;;  %v15_v7 = vld [vmem:[%s598_s0 + $0x8] sm:$0xff]  ;;  %s522_s0 = smov 96  }
   0x3   :  { %v504_v6 = vpack.c.bf16 %v19_v4, %v18_v2  ;;  %477 = vmatprep.mubr.msk.f32.mxu0 %vm27_vm0, %v14_v5  ;;  %v446_v9 = vld [vmem:[%s599_s2] ss:$0 sm:$0xff]  ;;  %s523_s2 = smov 64  }
   0x4   :  { %501 = vmatprep.subr.bf16.mxu0 %v500_v3 }
   0x5   :  { %503 = vmatpush3.bf16.msra.mxu0 %v500_v3 }
   0x6   :  { %505 = vmatprep.subr.bf16.mxu0 %v504_v6 }
   0x9   :  { %507 = vmatpush3.bf16.msra.mxu0 %v504_v6 }
   0xa   :  { %490 = vmatprep.subr.mxu0 %v520_v8 }
   0xc   :  { %478 = vmatmul.mubr.msk.f32.vlgmr.msra.gmra.mrb[0].mxu0 %vm27_vm0, %v15_v7 }
   0xd   :  { %492 = vmatprep.mubr.msk.f32.mxu0 %vm521_vm1, %v520_v8 }
  0xdf   :  { %v479_v10 = vpop.f32.mrb[0].mxu0 }
  0xe0   :  { %v100_v11 = vpop.f32.mrb[1].mxu0  ;;  %v106_v13 = vadd.f32 %v479_v10, %v446_v9 }
  0xe1   :  { %v101_v12 = vadd.f32 %v446_v9, %v100_v11 }
  0xe3   :  { %110 = vrot.lane.b32.xlu0 %v101_v12, %s522_s0 }
  0xe7   :  { %277 = vrot.lane.b32.xlu0 %v106_v13, %s522_s0 }
 0x155   :  { %v111_v14 = vpop.permute.xlu0 %110 }
 0x156   :  { %481 = vmatpush3.xpose.msk.msra.mxu1 %vm27_vm0, %v111_v14 }
 0x157   :  { %485 = vmatprep.subr.mxu1 %v520_v8 }
 0x159   :  { %483 = vmatmul.mubr.msk.f32.vlgmr.msra.gmra.mrb[0].mxu1 %vm27_vm0, %v101_v12  ;;  %v278_v15 = vpop.permute.xlu0 %277 }
 0x15a   :  { %491 = vmatpush3.xpose.msk.msra.mxu0 %vm27_vm0, %v278_v15  ;;  %487 = vmatprep.mubr.msk.f32.mxu1 %vm521_vm1, %v520_v8 }
 0x15d   :  { %493 = vmatmul.mubr.msk.f32.vlgmr.msra.gmra.mrb[2].mxu0 %vm27_vm0, %v106_v13 }
 0x22c   :  { %v182_v16 = vpop.f32.mrb[0].mxu1 }
 0x22d   :  { %v186_v17 = vmul.f32 0.17677669, %v182_v16  ;;  %v484_v18 = vpop.f32.mrb[1].mxu1 }
 0x22f   :  { %v188_v19 = vsel %vm187_vm2, %v186_v17, -inf }
 0x230   :  { %189 = vmax.xlane.f32.xlu1 %v188_v19  ;;  %v349_v20 = vpop.f32.mrb[2].mxu0 }
 0x231   :  { %v353_v21 = vmul.f32 0.17677669, %v349_v20  ;;  %v494_v22 = vpop.f32.mrb[3].mxu0 }
 0x233   :  { %v354_v23 = vsel %vm187_vm2, %v353_v21, -inf }
 0x234   :  { %355 = vmax.xlane.f32.xlu1 %v354_v23 }
 0x2bd   :  { %v190_v24 = vpop.xlane.xlu1 %189 }
 0x2be   :  { %v191_v25 = vsub.f32 %v186_v17, %v190_v24 }
 0x2c0   :  { %v192_v26 = vmul.f32 1.442695, %v191_v25 }
 0x2c1   :  { %v356_v27 = vpop.xlane.xlu1 %355 }
 0x2c2   :  { %512 = vpow2.f32 %v192_v26  ;;  %v357_v28 = vsub.f32 %v353_v21, %v356_v27 }
 0x2c4   :  { %v358_v29 = vmul.f32 1.442695, %v357_v28 }
 0x2c6   :  { %514 = vpow2.f32 %v358_v29 }
 0x2cc   :  { %v513_v30 = vpop.eup %512 }
 0x2cd   :  { %v194_v31 = vsel %vm187_vm2, %v513_v30, 0.0 }
 0x2ce   :  { %195 = vadd.xlane.f32.xlu0 %v194_v31 }
 0x2d0   :  { %v515_v32 = vpop.eup %514 }
 0x2d1   :  { %v360_v33 = vsel %vm187_vm2, %v515_v32, 0.0 }
 0x2d2   :  { %361 = vadd.xlane.f32.xlu1 %v360_v33 }
 0x2e3   :  { %199 = vrot.lane.b32.xlu1 %v101_v12, %s523_s2 }
 0x2e7   :  { %365 = vrot.lane.b32.xlu1 %v106_v13, %s523_s2 }
 0x35b   :  { %v196_v34 = vpop.xlane.xlu0 %195 }
 0x35c   :  { %516 = vrcp.f32 %v196_v34 }
 0x35f   :  { %v362_v35 = vpop.xlane.xlu1 %361 }
 0x360   :  { %518 = vrcp.f32 %v362_v35 }
 0x363   :  { %v200_v36 = vpop.permute.xlu1 %199 }
 0x364   :  { %486 = vmatpush3.msra.mxu1 %v200_v36 }
 0x365   :  { %495 = vmatprep.subr.mxu1 %v520_v8 }
 0x366   :  { %v517_v37 = vpop.eup %516 }
 0x367   :  { %v198_v38 = vmul.f32 %v517_v37, %v513_v30  ;;  %v366_v39 = vpop.permute.xlu1 %365 }
 0x369   :  { %488 = vmatmul.mubr.msk.f32.vlgmr.msra.gmra.mrb[2].mxu1 %vm187_vm2, %v198_v38 }
 0x36a   :  { %v519_v40 = vpop.eup %518  ;;  %496 = vmatpush3.msra.mxu1 %v366_v39  ;;  %497 = vmatprep.mubr.msk.f32.mxu1 %vm521_vm1, %v520_v8 }
 0x36b   :  { %v364_v41 = vmul.f32 %v519_v40, %v515_v32 }
 0x36d   :  { %498 = vmatmul.mubr.msk.f32.vlgmr.msra.gmra.mrb[4].mxu1 %vm187_vm2, %v364_v41 }
 0x43c   :  { %v271_v42 = vpop.f32.mrb[2].mxu1 }
 0x43d   :  { %275 = vst.msk [vmem:[%s600_s3] sm:$0xff] %vm27_vm0, %v271_v42  ;;  %v489_v43 = vpop.f32.mrb[3].mxu1 }
 0x440   :  { %v437_v44 = vpop.f32.mrb[4].mxu1 }
 0x441   :  { %441 = vst.msk [vmem:[%s600_s3 + $0x8] sm:$0xff] %vm27_vm0, %v437_v44  ;;  %v499_v45 = vpop.f32.mrb[5].mxu1 }

</bundles_post_ra>
